<compile_context>
chip_gen: v7x
topology: tpu7x:2x2x1
jax: 0.10.0
libtpu: 0.0.40
codegen_flags: <defaults>
</compile_context>

<pallas_src>
import functools

import jax
import jax.numpy as jnp
from jax.experimental import pallas as pl
from jax.experimental.pallas import tpu as pltpu


_LANE = 128
_SUBLANE = 8


def _round_up(n, m):
    return ((n + m - 1) // m) * m


@functools.lru_cache(maxsize=1)
def _vmem_limit_bytes():
    """~75% of this generation's VMEM (96 MiB v5e/v6e, 48 MiB v7x); 48 MiB fallback."""
    try:
        cap = int(pltpu.get_tpu_info().vmem_capacity_bytes)
    except Exception:
        cap = 64 * 1024 * 1024
    return (cap * 3) // 4


# ----------------------------- kernels ------------------------------------ #

def _mlp_kernel(x_ref, w1_ref, b1_ref, w2_ref, b2_ref, o_ref):
    """Linear -> ReLU -> (Dropout: identity in eval) -> Linear on one batch tile."""
    x = x_ref[...]
    if x.dtype != w1_ref.dtype:       # bf16 compute: cast on vregs, not as a wrapper pass
        x = x.astype(w1_ref.dtype)
    h = jnp.dot(x, w1_ref[...], preferred_element_type=jnp.float32)
    # Bias add + ReLU in f32 vregs (safe on v5e's f32-only VPU); biases are stored f32.
    h = jnp.maximum(h + b1_ref[...], 0.0)
    # Dropout(p=0.2) in eval mode == identity.
    if w2_ref.dtype != h.dtype:        # keep the fast MXU input path when W2 is bf16/fp8
        h = h.astype(w2_ref.dtype)
    out = jnp.dot(h, w2_ref[...], preferred_element_type=jnp.float32) + b2_ref[...]
    o_ref[...] = out.astype(o_ref.dtype)


def _linear_kernel(x_ref, w_ref, b_ref, o_ref):
    """Single Linear layer (hidden_size=None path)."""
    x = x_ref[...]
    if x.dtype != w_ref.dtype:
        x = x.astype(w_ref.dtype)
    out = jnp.dot(x, w_ref[...], preferred_element_type=jnp.float32) + b_ref[...]
    o_ref[...] = out.astype(o_ref.dtype)


# ----------------------------- params prep --------------------------------- #

def prepare_params(params, *, compute_dtype=None):
    """Pad/cast weights once (cache the result to avoid per-call pad/convert ops).

    params use (in, out) weight layout (transposed PyTorch Linear):
      single-layer: {"w1": (in, out), "b1": (out,)}
      two-layer   : {"w1": (in, hid), "b1": (hid,), "w2": (hid, out), "b2": (out,)}
    compute_dtype: optional MXU input dtype for the weights (x is cast in-kernel);
                   ignored if params are already prepared.
    """
    if isinstance(params, dict) and params.get("_prepared", False):
        return params

    two_layer = "w2" in params
    w1, b1 = params["w1"], params["b1"]
    in_dim = w1.shape[0]
    if two_layer:
        w2, b2 = params["w2"], params["b2"]
        out_dim = w2.shape[1]
    else:
        out_dim = w1.shape[1]

    cd = compute_dtype
    if cd is None:
        cd = w1.dtype
        # Auto-downcast oversized f32 weights so they stay comfortably VMEM-resident
        # (double-buffered) under the per-generation limit.
        resident = w1.size * jnp.dtype(w1.dtype).itemsize
        if two_layer:
            resident += w2.size * jnp.dtype(w2.dtype).itemsize
        if jnp.dtype(cd) == jnp.float32 and 2 * resident > _vmem_limit_bytes() // 2:
            cd = jnp.bfloat16
    cd = jnp.dtype(cd)

    out_p = _round_up(out_dim, _LANE)

    def pad_cols(a, cols, dtype):
        return jnp.pad(a, ((0, 0), (0, cols - a.shape[1]))).astype(dtype)

    prepared = {
        "_prepared": True,
        "two_layer": two_layer,
        "in_dim": in_dim,
        "out_dim": out_dim,
        "out_p": out_p,
    }
    if two_layer:
        prepared["w1"] = w1.astype(cd)                               # (in, hid), contraction dims natural
        prepared["b1"] = b1.reshape(1, -1).astype(jnp.float32)       # (1, hid)
        prepared["w2"] = pad_cols(w2, out_p, cd)                     # (hid, out_p) lane-dense output
        prepared["b2"] = pad_cols(b2.reshape(1, -1), out_p, jnp.float32)
    else:
        prepared["w1"] = pad_cols(w1, out_p, cd)                     # (in, out_p)
        prepared["b1"] = pad_cols(b1.reshape(1, -1), out_p, jnp.float32)
    return prepared


# ----------------------------- wrapper ------------------------------------- #

def _batch_tile(batch, tile_b):
    if batch <= _SUBLANE:
        return batch                                   # single full-extent block (legal)
    tb = min(_round_up(tile_b, _SUBLANE), _round_up(batch, _SUBLANE))
    # Guarantee >= 2 grid steps when the batch allows so v7x's 2 TensorCores split the work.
    tb = min(tb, _round_up(pl.cdiv(batch, 2), _SUBLANE))
    return max(tb, _SUBLANE)


def recommender_forward(x, params, *, compute_dtype=None, tile_b=1024):
    """RecommenderModel forward with a Pallas TPU kernel.

    x: (batch, input_size).  params: raw param dict or prepare_params() output.
    compute_dtype: optional MXU input dtype (e.g. jnp.bfloat16) for the weights; x is cast
                   in-kernel.  Accumulation is always f32; biases stay f32.
    """
    p = prepare_params(params, compute_dtype=compute_dtype)
    batch, in_dim = x.shape
    assert in_dim == p["in_dim"], (in_dim, p["in_dim"])
    out_dim, out_p = p["out_dim"], p["out_p"]

    tb = _batch_tile(batch, tile_b)
    grid = (pl.cdiv(batch, tb),)

    def resident(arr):
        # Constant index_map: weights/biases are fetched once and stay VMEM-resident.
        return pl.BlockSpec(arr.shape, lambda i: (0, 0))

    compiler_params = pltpu.CompilerParams(
        dimension_semantics=("parallel",),     # megacore: batch tiles split across TensorCores
        vmem_limit_bytes=_vmem_limit_bytes(),
    )

    if p["two_layer"]:
        w1, b1, w2, b2 = p["w1"], p["b1"], p["w2"], p["b2"]
        out = pl.pallas_call(
            _mlp_kernel,
            out_shape=jax.ShapeDtypeStruct((batch, out_p), x.dtype),
            grid=grid,
            in_specs=[
                pl.BlockSpec((tb, in_dim), lambda i: (i, 0)),   # x streams unpadded/uncast
                resident(w1),
                resident(b1),
                resident(w2),
                resident(b2),
            ],
            out_specs=pl.BlockSpec((tb, out_p), lambda i: (i, 0)),
            compiler_params=compiler_params,
        )(x, w1, b1, w2, b2)
    else:
        w1, b1 = p["w1"], p["b1"]
        out = pl.pallas_call(
            _linear_kernel,
            out_shape=jax.ShapeDtypeStruct((batch, out_p), x.dtype),
            grid=grid,
            in_specs=[
                pl.BlockSpec((tb, in_dim), lambda i: (i, 0)),
                resident(w1),
                resident(b1),
            ],
            out_specs=pl.BlockSpec((tb, out_p), lambda i: (i, 0)),
            compiler_params=compiler_params,
        )(x, w1, b1)

    # Drop the lane padding of the class dim outside the kernel (kernel stays lane-dense).
    return out if out_p == out_dim else out[:, :out_dim]


# --------------------------- init & reference ------------------------------ #

def init_params(key, input_size, num_classes, hidden_size=None, dtype=jnp.float32):
    """PyTorch-Linear-style init, weights stored (in, out)."""
    def linear_init(k, fan_in, fan_out):
        kw, kb = jax.random.split(k)
        bound = 1.0 / jnp.sqrt(jnp.array(fan_in, dtype=jnp.float32))
        w = jax.random.uniform(kw, (fan_in, fan_out), dtype, -bound, bound)
        b = jax.random.uniform(kb, (fan_out,), dtype, -bound, bound)
        return w, b

    if hidden_size is None:
        w1, b1 = linear_init(key, input_size, num_classes)
        return {"w1": w1, "b1": b1}
    k1, k2 = jax.random.split(key)
    w1, b1 = linear_init(k1, input_size, hidden_size)
    w2, b2 = linear_init(k2, hidden_size, num_classes)
    return {"w1": w1, "b1": b1, "w2": w2, "b2": b2}


def reference_forward(x, params):
    """Pure-JAX reference (eval-mode dropout == identity)."""
    if "w2" in params:
        h = jnp.maximum(x @ params["w1"] + params["b1"], 0.0)
        return h @ params["w2"] + params["b2"]
    return x @ params["w1"] + params["b1"]


# ------------------------------- main -------------------------------------- #

if __name__ == "__main__":
    key = jax.random.PRNGKey(0)
    k_x, k_p1, k_p2, k_x2 = jax.random.split(key, 4)

    batch = 8
    input_size = 32
    hidden_size = 32
    num_classes = 16

    x = jax.random.normal(k_x, (batch, input_size), dtype=jnp.float32)

    # 1) Two-layer path, f32 compute, weights padded/cast once via prepare_params.
    params_mlp = init_params(k_p1, input_size, num_classes, hidden_size)
    prepared_mlp = prepare_params(params_mlp)
    out_mlp = jax.block_until_ready(recommender_forward(x, prepared_mlp))
    ref_mlp = reference_forward(x, params_mlp)
    assert out_mlp.shape == (batch, num_classes)
    assert jnp.allclose(out_mlp, ref_mlp, atol=1e-5, rtol=1e-5)

    # 2) Single-layer path (hidden_size=None).
    params_lin = init_params(k_p2, input_size, num_classes, None)
    out_lin = jax.block_until_ready(recommender_forward(x, params_lin))
    ref_lin = reference_forward(x, params_lin)
    assert out_lin.shape == (batch, num_classes)
    assert jnp.allclose(out_lin, ref_lin, atol=1e-5, rtol=1e-5)

    # 3) Multi-tile batch grid with a ragged last tile (300 rows, tile 128 -> grid 3).
    x_big = jax.random.normal(k_x2, (300, input_size), dtype=jnp.float32)
    out_big = jax.block_until_ready(recommender_forward(x_big, prepared_mlp, tile_b=128))
    ref_big = reference_forward(x_big, params_mlp)
    assert out_big.shape == (300, num_classes)
    assert jnp.allclose(out_big, ref_big, atol=1e-5, rtol=1e-5)

    # 4) Default tile heuristic (>= 2 grid steps) + bf16 weight compute (f32 accumulation).
    out_bf16 = jax.block_until_ready(
        recommender_forward(x_big, params_mlp, compute_dtype=jnp.bfloat16))
    assert out_bf16.shape == (300, num_classes)
    assert jnp.allclose(out_bf16, ref_big, atol=5e-2, rtol=5e-2)

    print("KERNEL_OK")
</pallas_src>

<mosaic_0001>
module attributes {stable_mosaic.version = 11 : i64} {
  func.func @_mlp_kernel(%arg0: i32, %arg1: memref<8x32xf32, #tpu.memory_space<vmem>>, %arg2: memref<32x32xf32, #tpu.memory_space<vmem>>, %arg3: memref<1x32xf32, #tpu.memory_space<vmem>>, %arg4: memref<32x128xf32, #tpu.memory_space<vmem>>, %arg5: memref<1x128xf32, #tpu.memory_space<vmem>>, %arg6: memref<8x128xf32, #tpu.memory_space<vmem>>) attributes {dimension_semantics = [#tpu.dimension_semantics<parallel>], iteration_bounds = array<i64: 1>, scalar_prefetch = 0 : i64, scratch_operands = 0 : i64, tpu.core_type = #tpu.core_type<tc>, window_params = [{transform_indices = @transform_0, window_bounds = array<i64: 8, 32>}, {pipeline_mode = #tpu.pipeline_mode<synchronous>, transform_indices = @transform_1, window_bounds = array<i64: 32, 32>}, {pipeline_mode = #tpu.pipeline_mode<synchronous>, transform_indices = @transform_2, window_bounds = array<i64: 1, 32>}, {pipeline_mode = #tpu.pipeline_mode<synchronous>, transform_indices = @transform_3, window_bounds = array<i64: 32, 128>}, {pipeline_mode = #tpu.pipeline_mode<synchronous>, transform_indices = @transform_4, window_bounds = array<i64: 1, 128>}, {transform_indices = @transform_5, window_bounds = array<i64: 8, 128>}]} {
    %c0 = arith.constant 0 : index
    %c0_0 = arith.constant 0 : index
    %0 = vector.load %arg1[%c0, %c0_0] : memref<8x32xf32, #tpu.memory_space<vmem>>, vector<8x32xf32>
    %c0_1 = arith.constant 0 : index
    %c0_2 = arith.constant 0 : index
    %1 = vector.load %arg2[%c0_1, %c0_2] : memref<32x32xf32, #tpu.memory_space<vmem>>, vector<32x32xf32>
    %cst = arith.constant dense<0.000000e+00> : vector<8x32xf32>
    %2 = tpu.matmul %0, %1, %cst {dimension_numbers = #tpu.dot_dimension_numbers<[1], [0], [0], [1], [0, 0, 1, 1], [], []>} : vector<8x32xf32>, vector<32x32xf32>, vector<8x32xf32> -> vector<8x32xf32>
    %c0_3 = arith.constant 0 : index
    %c0_4 = arith.constant 0 : index
    %3 = vector.load %arg3[%c0_3, %c0_4] : memref<1x32xf32, #tpu.memory_space<vmem>>, vector<1x32xf32>
    %4 = vector.broadcast %3 : vector<1x32xf32> to vector<8x32xf32>
    %5 = arith.addf %2, %4 : vector<8x32xf32>
    %cst_5 = arith.constant 0.000000e+00 : f32
    %6 = vector.broadcast %cst_5 : f32 to vector<8x32xf32>
    %7 = arith.maximumf %5, %6 : vector<8x32xf32>
    %c0_6 = arith.constant 0 : index
    %c0_7 = arith.constant 0 : index
    %8 = vector.load %arg4[%c0_6, %c0_7] : memref<32x128xf32, #tpu.memory_space<vmem>>, vector<32x128xf32>
    %cst_8 = arith.constant dense<0.000000e+00> : vector<8x128xf32>
    %9 = tpu.matmul %7, %8, %cst_8 {dimension_numbers = #tpu.dot_dimension_numbers<[1], [0], [0], [1], [0, 0, 1, 1], [], []>} : vector<8x32xf32>, vector<32x128xf32>, vector<8x128xf32> -> vector<8x128xf32>
    %c0_9 = arith.constant 0 : index
    %c0_10 = arith.constant 0 : index
    %10 = vector.load %arg5[%c0_9, %c0_10] : memref<1x128xf32, #tpu.memory_space<vmem>>, vector<1x128xf32>
    %11 = vector.broadcast %10 : vector<1x128xf32> to vector<8x128xf32>
    %12 = arith.addf %9, %11 : vector<8x128xf32>
    %c0_11 = arith.constant 0 : index
    %c0_12 = arith.constant 0 : index
    %13 = vector.load %arg6[%c0_11, %c0_12] : memref<8x128xf32, #tpu.memory_space<vmem>>, vector<8x128xf32>
    tpu.vector_store %arg6[%c0_11, %c0_12], %12 {strides = array<i32>} : memref<8x128xf32, #tpu.memory_space<vmem>>, vector<8x128xf32>,
    return
  }
  func.func @transform_0(%arg0: i32) -> (i32, i32) {
    %c0_i32 = arith.constant 0 : i32
    %c0_i32_0 = arith.constant 0 : i32
    return %arg0, %c0_i32 : i32, i32
  }
  func.func @transform_1(%arg0: i32) -> (i32, i32) {
    %c0_i32 = arith.constant 0 : i32
    %c0_i32_0 = arith.constant 0 : i32
    %c0_i32_1 = arith.constant 0 : i32
    return %c0_i32, %c0_i32_0 : i32, i32
  }
  func.func @transform_2(%arg0: i32) -> (i32, i32) {
    %c0_i32 = arith.constant 0 : i32
    %c0_i32_0 = arith.constant 0 : i32
    %c0_i32_1 = arith.constant 0 : i32
    return %c0_i32, %c0_i32_0 : i32, i32
  }
  func.func @transform_3(%arg0: i32) -> (i32, i32) {
    %c0_i32 = arith.constant 0 : i32
    %c0_i32_0 = arith.constant 0 : i32
    %c0_i32_1 = arith.constant 0 : i32
    return %c0_i32, %c0_i32_0 : i32, i32
  }
  func.func @transform_4(%arg0: i32) -> (i32, i32) {
    %c0_i32 = arith.constant 0 : i32
    %c0_i32_0 = arith.constant 0 : i32
    %c0_i32_1 = arith.constant 0 : i32
    return %c0_i32, %c0_i32_0 : i32, i32
  }
  func.func @transform_5(%arg0: i32) -> (i32, i32) {
    %c0_i32 = arith.constant 0 : i32
    %c0_i32_0 = arith.constant 0 : i32
    return %arg0, %c0_i32 : i32, i32
  }
}

</mosaic_0001>

<bundles_post_ra>
// kernel: tpu_custom_call.1
= control target key start
LH: loop header
LB: loop body
LE: loop exit
PB: predicated region body
PF: predicated region fallthrough
CT: control target
= control target key end

     0   :  { %10 = vsyncpa [#allocation3], 0  ;;  %s498_s0 = inlined_call_operand.hbm [shape: f32[8,32], index: 0, kind: input, shape index: {}]   ;;  %s499_s1 = inlined_call_operand.hbm [shape: f32[32,32], index: 1, kind: input, shape index: {}]   ;;  %s500_s2 = inlined_call_operand.vmem [shape: f32[1,32], index: 2, kind: input, shape index: {}]   ;;  %s501_s3 = inlined_call_operand.hbm [shape: f32[32,128], index: 3, kind: input, shape index: {}]   ;;  %s502_s4 = inlined_call_operand.vmem [shape: f32[1,128], index: 4, kind: input, shape index: {}]   ;;  %s503_s5 = inlined_call_operand.hbm [shape: f32[8,128], index: 5, kind: output, shape index: {}]  }
   0x1   :  { %11 = vsyncpa [#allocation6], 0 }
   0x2   :  { %12 = vsyncpa [#allocation4], 0  ;;  %s399_s18 = smov [#allocation5]   ;;  %s305_s22 = scalar_lea.hbm %s499_s1, 512 }
   0x3   :  { %s28_s19 = sshll.u32 %s399_s18, 4  ;;  %p306_p0 = scmp.ne.s32.totalorder %s499_s1, %s305_s22  ;;  %s29_s19 = int_to_ptr.vmem [resolvable:$true] %s28_s19 }
   0x4   :  { %p309_p1 = scmp.lt.u32.totalorder %s305_s22, %s499_s1 }
   0x6   :  { %p311_p2 = pnand %p309_p1, %p306_p0 }
   0x8   :  { %314 = shalt.err (!%p311_p2)
}
   0x9   :  { %s315_s27 = scalar_lea.vmem %s29_s19, 512  ;;  %p320_p4 = scmp.lt.s32.totalorder %s29_s19, %s29_s19 }
   0xa   :  { %p316_p3 = scmp.ne.s32.totalorder %s29_s19, %s315_s27  ;;  %p321_p5 = scmp.lt.s32.totalorder %s315_s27, %s315_s27 }
   0xc   :  { %p322_p6 = por %p321_p5, %p320_p4 }
   0xe   :  { %p323_p7 = pnand %p322_p6, %p316_p3 }
  0x10   :  { %326 = shalt.err (!%p323_p7)
}
  0x11   :  { %s400_s28 = smov 128   ;;  %s401_s29 = smov 8  }
  0x12   :  { %34 = dma.hbm_to_vmem [thread:$0]  %s499_s1, 512, %s29_s19, [#allocation6], %s400_s28, %s400_s28, %s401_s29  }
  0x13   :  { %s402_s7 = smov [#allocation2]   ;;  %s403_s9 = smov [#allocation7]  }
  0x14   :  { %s19_s8 = sshll.u32 %s402_s7, 4  ;;  %s42_s10 = sshll.u32 %s403_s9, 4  ;;  %s20_s8 = int_to_ptr.vmem [resolvable:$true] %s19_s8  ;;  %s43_s10 = int_to_ptr.vmem [resolvable:$true] %s42_s10 }
  0x15   :  { %s327_s13 = scalar_lea.hbm %s498_s0, 128 }
  0x16   :  { %p328_p8 = scmp.ne.s32.totalorder %s498_s0, %s327_s13  ;;  %p331_p9 = scmp.lt.u32.totalorder %s327_s13, %s498_s0 }
  0x18   :  { %p333_p10 = pnand %p331_p9, %p328_p8 }
  0x1a   :  { %336 = shalt.err (!%p333_p10)
}
  0x1b   :  { %s337_s1 = scalar_lea.vmem %s20_s8, 128  ;;  %p342_p12 = scmp.lt.s32.totalorder %s20_s8, %s20_s8 }
  0x1c   :  { %p338_p11 = scmp.ne.s32.totalorder %s20_s8, %s337_s1  ;;  %p343_p13 = scmp.lt.s32.totalorder %s337_s1, %s337_s1 }
  0x1e   :  { %p344_p0 = por %p343_p13, %p342_p12 }
  0x20   :  { %p345_p1 = pnand %p344_p0, %p338_p11 }
  0x22   :  { %348 = shalt.err (!%p345_p1)
}
  0x23   :  { %22 = dma.hbm_to_vmem [thread:$0]  %s498_s0, 128, %s20_s8, [#allocation3]  }
  0x24   :  { %s349_s22 = scalar_lea.hbm %s501_s3, 512 }
  0x25   :  { %p350_p2 = scmp.ne.s32.totalorder %s501_s3, %s349_s22  ;;  %p353_p3 = scmp.lt.u32.totalorder %s349_s22, %s501_s3 }
  0x27   :  { %p355_p4 = pnand %p353_p3, %p350_p2 }
  0x29   :  { %358 = shalt.err (!%p355_p4)
}
  0x2a   :  { %s359_s27 = scalar_lea.vmem %s43_s10, 512  ;;  %p364_p6 = scmp.lt.s32.totalorder %s43_s10, %s43_s10 }
  0x2b   :  { %p360_p5 = scmp.ne.s32.totalorder %s43_s10, %s359_s27  ;;  %p365_p7 = scmp.lt.s32.totalorder %s359_s27, %s359_s27 }
  0x2d   :  { %p366_p8 = por %p365_p7, %p364_p6 }
  0x2f   :  { %p367_p9 = pnand %p366_p8, %p360_p5 }
  0x31   :  { %370 = shalt.err (!%p367_p9)
}
  0x32   :  { %48 = dma.hbm_to_vmem [thread:$0]  %s501_s3, 512, %s43_s10, [#allocation6], %s400_s28, %s400_s28, %s401_s29  }
  0x33   :  { %393 = dma.done.wait [#allocation3], 128  }
  0x34   :  { %394 = vsyncadd [#allocation3], 4294967168 }
  0x35   :  { %395 = dma.done.wait [#allocation6], 1024  }
  0x36   :  { %396 = vsyncadd [#allocation6], 4294966272  ;;  %v404_v0 = vmov 0.0|0.0   ;;  %vm405_vm0 = vmmov 0   ;;  %v406_v1 = vmov 0.0   ;;  %v61_v2 = vld [vmem:[#allocation5] sm:$0xff] }
  0x37   :  { %284 = vmatprep.subr.bf16.mxu0 %v404_v0  ;;  %270 = vmatprep.mubr.msk.f32.mxu0 %vm405_vm0, %v406_v1  ;;  %v62_v3 = vld [vmem:[#allocation5 + $0x8] sm:$0xff]  ;;  %v63_v4 = vld [vmem:[#allocation5 + $0x10] sm:$0xff]  ;;  %v64_v6 = vld [vmem:[#allocation5 + $0x18] sm:$0xff]  ;;  %vm72_vm1 = vcmask 261120   ;;  %s407_s7 = smov [#allocation8]  }
  0x38   :  { %290 = vmatprep.subr.bf16.mxu1 %v404_v0  ;;  %281 = vmatprep.mubr.msk.f32.mxu1 %vm405_vm0, %v406_v1  ;;  %v285_v5 = vpack.c.bf16 %v62_v3, %v61_v2  ;;  %v147_v7 = vld [vmem:[#allocation7] sm:$0xff]  ;;  %v148_v8 = vld [vmem:[#allocation7 + $0x8] sm:$0xff]  ;;  %v288_v9 = vpack.c.bf16 %v64_v6, %v63_v4  ;;  %v60_v11 = vld [vmem:[#allocation2] sm:$0xff]  ;;  %s238_s8 = sshll.u32 %s407_s7, 4  ;;  %s239_s8 = int_to_ptr.vmem [resolvable:$true] %s238_s8 }
  0x39   :  { %v291_v10 = vpack.c.bf16 %v148_v8, %v147_v7  ;;  %v149_v12 = vld [vmem:[#allocation7 + $0x10] sm:$0xff]  ;;  %v150_v13 = vld [vmem:[#allocation7 + $0x18] sm:$0xff]  ;;  %s371_s9 = scalar_lea.vmem %s239_s8, 128  ;;  %p376_p11 = scmp.lt.s32.totalorder %s239_s8, %s239_s8 }
  0x3a   :  { %286 = vmatpush3.bf16.msra.mxu0 %v285_v5  ;;  %v294_v14 = vpack.c.bf16 %v150_v13, %v149_v12  ;;  %v248_v15 = vld [vmem:[%s500_s2] ss:$0 sm:$0xff]  ;;  %p372_p10 = scmp.ne.s32.totalorder %s239_s8, %s371_s9  ;;  %p377_p12 = scmp.lt.s32.totalorder %s371_s9, %s371_s9 }
  0x3b   :  { %287 = vmatprep.subr.bf16.mxu0 %v404_v0  ;;  %292 = vmatpush3.bf16.msra.mxu1 %v291_v10  ;;  %v250_v20 = vld [vmem:[%s502_s4] ss:$0 sm:$0xff] }
  0x3c   :  { %293 = vmatprep.subr.bf16.mxu1 %v404_v0  ;;  %p378_p13 = por %p377_p12, %p376_p11 }
  0x3e   :  { %289 = vmatpush3.bf16.msra.mxu0 %v288_v9  ;;  %p379_p0 = pnand %p378_p13, %p372_p10 }
  0x3f   :  { %295 = vmatpush3.bf16.msra.mxu1 %v294_v14 }
  0x41   :  { %271 = vmatmul.mubr.msk.f32.vlgmr.msra.gmra.mrb[0].mxu0 %vm72_vm1, %v60_v11 }
 0x114   :  { %v142_v16 = vpop.f32.mrb[0].mxu0 }
 0x115   :  { %v143_v17 = vadd.f32 %v248_v15, %v142_v16  ;;  %v272_v18 = vpop.f32.mrb[1].mxu0 }
 0x117   :  { %v146_v19 = vmax.f32 %v143_v17, 0.0 }
 0x119   :  { %282 = vmatmul.mubr.msk.f32.vlgmr.msra.gmra.mrb[0].mxu1 %vm72_vm1, %v146_v19 }
 0x1ec   :  { %v227_v21 = vpop.f32.mrb[0].mxu1 }
 0x1ed   :  { %v228_v22 = vadd.f32 %v250_v20, %v227_v21  ;;  %v283_v23 = vpop.f32.mrb[1].mxu1 }
 0x1ef   :  { %231 = vst [vmem:[#allocation8] sm:$0xff] %v228_v22 }
 0x1f0   :  { %382 = shalt.err (!%p379_p0)
}
 0x1f1   :  { %s383_s11 = scalar_lea.hbm %s503_s5, 128 }
 0x1f2   :  { %p384_p1 = scmp.ne.s32.totalorder %s503_s5, %s383_s11  ;;  %p387_p2 = scmp.lt.u32.totalorder %s383_s11, %s503_s5 }
 0x1f4   :  { %p389_p3 = pnand %p387_p2, %p384_p1 }
 0x1f6   :  { %392 = shalt.err (!%p389_p3)
}
 0x1f7   :  { %241 = dma.vmem_to_hbm [thread:$0]  %s239_s8, 128, %s503_s5, [#allocation4]  }
 0x1f8   :  { %397 = dma.done.wait [#allocation4], 128  }
 0x1f9   :  { %398 = vsyncadd [#allocation4], 4294967168 }
 0x1fa   :  { %245 = vsyncpa [#allocation3], 1 }
 0x1fb   :  { %246 = vsyncpa [#allocation6], 1 }
 0x1fc   :  { %247 = vsyncpa [#allocation4], 1 }

</bundles_post_ra>
